<compile_context>
chip_gen: v7x
topology: tpu7x:2x2x1
jax: 0.10.0
libtpu: 0.0.40
codegen_flags: <defaults>
</compile_context>

<pallas_src>
import functools

import jax
import jax.numpy as jnp
from jax.experimental import pallas as pl
from jax.experimental.pallas import tpu as pltpu


def _round_up(x, m):
    return ((x + m - 1) // m) * m


def _vmem_capacity_bytes():
    """Physical VMEM per TensorCore, with a conservative fallback."""
    try:
        info = pltpu.get_tpu_info()
        cap = getattr(info, "vmem_capacity_bytes", None)
        if cap:
            return int(cap)
    except Exception:
        pass
    return 64 * 1024 * 1024  # v7x per-TC VMEM (smallest of v5e/v6e/v7x)


# ---------------------------------------------------------------------------
# Path A: table resident in VMEM, in-VMEM dynamic-slice row gather.
# ---------------------------------------------------------------------------
def _vmem_gather_kernel(idx_ref, tab_ref, out_ref, *, rows_per_step):
    """idx_ref : SMEM (R_pad,) int32  -- scalar-prefetched flat word ids
       tab_ref : VMEM (V1, H)         -- embedding table, resident across grid
       out_ref : VMEM (rows_per_step, H) -- chunk; coalesced pipelined write-back
    """
    base = pl.multiple_of(pl.program_id(0) * rows_per_step, rows_per_step)

    def gather_one(r):
        word = idx_ref[base + r]
        out_ref[pl.ds(r, 1), :] = tab_ref[pl.ds(word, 1), :]

    if rows_per_step <= 64:
        for r in range(rows_per_step):       # small chunk: fully unrolled
            gather_one(r)
    else:
        def body(r, carry):
            gather_one(r)
            return carry

        jax.lax.fori_loop(0, rows_per_step, body, 0, unroll=8)


# ---------------------------------------------------------------------------
# Path B: large tables -- windowed HBM->VMEM per-row DMA gather.
# ---------------------------------------------------------------------------
def _dma_gather_kernel(idx_ref, tab_hbm, out_ref, sems, *, rows_per_step, window):
    """idx_ref : SMEM (R_pad,) int32
       tab_hbm : HBM (V1, H) table (memory_space=pl.ANY)
       out_ref : VMEM (rows_per_step, H) output chunk
       sems    : DMA semaphores, shape (window,)
    """
    base = pl.multiple_of(pl.program_id(0) * rows_per_step, rows_per_step)

    # Padding tokens (index 0) skip their DMA, so pre-zero the whole chunk.
    out_ref[...] = jnp.zeros_like(out_ref)

    words = []
    copies = []
    for r in range(rows_per_step):
        word = idx_ref[base + r]
        cp = pltpu.make_async_copy(
            tab_hbm.at[pl.ds(word, 1), :],
            out_ref.at[pl.ds(r, 1), :],
            sems.at[r % window],
        )

        # Bounded in-flight window: before reusing a semaphore slot, drain the
        # copy that last used it (waits happen in issue order, descriptors are
        # reused rather than rebuilt).
        if r >= window:
            prev = r - window

            @pl.when(words[prev] != 0)
            def _wait(cp_prev=copies[prev]):
                cp_prev.wait()

        @pl.when(word != 0)
        def _start(cp_new=cp):
            cp_new.start()

        words.append(word)
        copies.append(cp)

    # Drain the tail so the pipeline's write-back only sees completed data.
    for r in range(max(0, rows_per_step - window), rows_per_step):
        @pl.when(words[r] != 0)
        def _wait(cp_tail=copies[r]):
            cp_tail.wait()

    # TODO(synk): a mid-size-vocab variant (table fits VMEM but one chunk's
    # one-hot would not) could stage the table in VMEM scratch and reuse the
    # in-VMEM gather; omitted to keep the fallback simple.


# ---------------------------------------------------------------------------
# Wrapper == DescEmbeddingLayer.forward
# ---------------------------------------------------------------------------
def desc_embedding_forward(indices, table, *, rows_per_step=256, dma_window=16,
                           force_path=None):
    """indices: (N, S) int word ids in [0, wordNum] (0 == padding_idx)
       table:   (wordNum + 1, H) embedding weight, row 0 == 0
       returns: (N, S, H)
    """
    N, S = indices.shape
    V1, H = table.shape
    dtype_bytes = jnp.dtype(table.dtype).itemsize

    R = N * S
    rows = max(8, min(int(rows_per_step), _round_up(R, 8)))
    rows = _round_up(rows, 8)
    R_pad = _round_up(R, rows)

    # torch.nn.Embedding raises on out-of-range ids; we clamp to stay in
    # bounds (an id > wordNum reads the last row instead of erroring).
    flat_idx = jnp.clip(indices.reshape(-1).astype(jnp.int32), 0, V1 - 1)
    if R_pad != R:
        flat_idx = jnp.pad(flat_idx, (0, R_pad - R))      # pad with index 0

    grid = (R_pad // rows,)
    out_shape = jax.ShapeDtypeStruct((R_pad, H), table.dtype)

    # Per-generation VMEM budget: account for a (possibly double-buffered)
    # resident table plus double-buffered output chunks, with headroom.
    phys_vmem = _vmem_capacity_bytes()
    table_bytes = V1 * H * dtype_bytes
    chunk_bytes = rows * H * dtype_bytes
    vmem_needed = 2 * table_bytes + 2 * chunk_bytes + (2 << 20)
    fits_vmem = vmem_needed <= int(0.75 * phys_vmem)

    use_vmem_path = (force_path == "vmem") or (force_path is None and fits_vmem)

    if use_vmem_path:
        kernel = functools.partial(_vmem_gather_kernel, rows_per_step=rows)
        grid_spec = pltpu.PrefetchScalarGridSpec(
            num_scalar_prefetch=1,                           # flat_idx -> SMEM
            grid=grid,
            # Constant index_map => the table is DMA'd into VMEM once and
            # stays resident for every chunk.
            in_specs=[pl.BlockSpec((V1, H), lambda i, idx: (0, 0))],
            out_specs=pl.BlockSpec((rows, H), lambda i, idx: (i, 0)),
        )
        vmem_limit = int(min(max(vmem_needed, 32 * 1024 * 1024), phys_vmem))
    else:
        window = max(1, min(int(dma_window), rows))
        kernel = functools.partial(_dma_gather_kernel, rows_per_step=rows,
                                   window=window)
        grid_spec = pltpu.PrefetchScalarGridSpec(
            num_scalar_prefetch=1,
            grid=grid,
            in_specs=[pl.BlockSpec(memory_space=pl.ANY)],    # table stays in HBM
            out_specs=pl.BlockSpec((rows, H), lambda i, idx: (i, 0)),
            scratch_shapes=[pltpu.SemaphoreType.DMA((window,))],
        )
        vmem_limit = int(min(max(4 * chunk_bytes + (2 << 20), 32 * 1024 * 1024),
                             phys_vmem))

    out_flat = pl.pallas_call(
        kernel,
        out_shape=out_shape,
        grid_spec=grid_spec,
        compiler_params=pltpu.CompilerParams(
            dimension_semantics=("parallel",),   # independent chunks (v7x: 2 TCs)
            vmem_limit_bytes=vmem_limit,
        ),
    )(flat_idx, table)

    return out_flat[:R].reshape(N, S, H)


if __name__ == "__main__":
    # Module hyper-params (small, synthetic; match the PyTorch module).
    wordNum = 50          # vocab size (embedding has wordNum + 1 rows)
    h_dim = 32
    batch = 2             # number of word-index vectors being stacked
    seq = 8               # words per description

    key = jax.random.PRNGKey(0)
    k_tab, k_idx = jax.random.split(key)

    # nn.Embedding(wordNum + 1, h_dim, padding_idx=0): row 0 zeroed.
    table = jax.random.normal(k_tab, (wordNum + 1, h_dim), dtype=jnp.float32)
    table = table.at[0].set(0.0)

    # Word ids in [0, wordNum]; force a few padding (0) entries.
    indices = jax.random.randint(k_idx, (batch, seq), 0, wordNum + 1,
                                 dtype=jnp.int32)
    indices = indices.at[0, 0].set(0)
    indices = indices.at[1, 3].set(0)

    out = desc_embedding_forward(indices, table)
    out = jax.block_until_ready(out)

    # Reference: plain JAX gather (== torch.stack([emb(words) for words ...])).
    ref = jnp.take(table, indices, axis=0)

    assert out.shape == (batch, seq, h_dim), out.shape
    assert bool(jnp.array_equal(out, ref)), "mismatch vs reference gather"
    print("KERNEL_OK")
</pallas_src>

<mosaic_0001>
module attributes {stable_mosaic.version = 11 : i64} {
  func.func @_vmem_gather_kernel(%arg0: i32, %arg1: memref<16xi32, #tpu.memory_space<smem>>, %arg2: memref<51x32xf32, #tpu.memory_space<vmem>>, %arg3: memref<16x32xf32, #tpu.memory_space<vmem>>) attributes {dimension_semantics = [#tpu.dimension_semantics<parallel>], iteration_bounds = array<i64: 1>, scalar_prefetch = 1 : i64, scratch_operands = 0 : i64, tpu.core_type = #tpu.core_type<tc>, window_params = [{pipeline_mode = #tpu.pipeline_mode<synchronous>, transform_indices = @transform_0, window_bounds = array<i64: 51, 32>}, {transform_indices = @transform_1, window_bounds = array<i64: 16, 32>}]} {
    %c16_i32 = arith.constant 16 : i32
    %0 = arith.muli %arg0, %c16_i32 : i32
    %1 = tpu.assume_multiple %0, 16 : i32
    %c0_i32 = arith.constant 0 : i32
    %2 = arith.addi %1, %c0_i32 : i32
    %3 = arith.index_cast %2 : i32 to index
    %4 = memref.load %arg1[%3] : memref<16xi32, #tpu.memory_space<smem>>
    %5 = arith.index_cast %4 : i32 to index
    %c0 = arith.constant 0 : index
    %6 = vector.load %arg2[%5, %c0] : memref<51x32xf32, #tpu.memory_space<vmem>>, vector<1x32xf32>
    %c0_0 = arith.constant 0 : index
    %c0_1 = arith.constant 0 : index
    %7 = vector.load %arg3[%c0_0, %c0_1] : memref<16x32xf32, #tpu.memory_space<vmem>>, vector<1x32xf32>
    tpu.vector_store %arg3[%c0_0, %c0_1], %6 {strides = array<i32>} : memref<16x32xf32, #tpu.memory_space<vmem>>, vector<1x32xf32>,
    %c1_i32 = arith.constant 1 : i32
    %8 = arith.addi %1, %c1_i32 : i32
    %9 = arith.index_cast %8 : i32 to index
    %10 = memref.load %arg1[%9] : memref<16xi32, #tpu.memory_space<smem>>
    %11 = arith.index_cast %10 : i32 to index
    %c0_2 = arith.constant 0 : index
    %12 = vector.load %arg2[%11, %c0_2] : memref<51x32xf32, #tpu.memory_space<vmem>>, vector<1x32xf32>
    %c1 = arith.constant 1 : index
    %c0_3 = arith.constant 0 : index
    %13 = vector.load %arg3[%c1, %c0_3] : memref<16x32xf32, #tpu.memory_space<vmem>>, vector<1x32xf32>
    tpu.vector_store %arg3[%c1, %c0_3], %12 {strides = array<i32>} : memref<16x32xf32, #tpu.memory_space<vmem>>, vector<1x32xf32>,
    %c2_i32 = arith.constant 2 : i32
    %14 = arith.addi %1, %c2_i32 : i32
    %15 = arith.index_cast %14 : i32 to index
    %16 = memref.load %arg1[%15] : memref<16xi32, #tpu.memory_space<smem>>
    %17 = arith.index_cast %16 : i32 to index
    %c0_4 = arith.constant 0 : index
    %18 = vector.load %arg2[%17, %c0_4] : memref<51x32xf32, #tpu.memory_space<vmem>>, vector<1x32xf32>
    %c2 = arith.constant 2 : index
    %c0_5 = arith.constant 0 : index
    %19 = vector.load %arg3[%c2, %c0_5] : memref<16x32xf32, #tpu.memory_space<vmem>>, vector<1x32xf32>
    tpu.vector_store %arg3[%c2, %c0_5], %18 {strides = array<i32>} : memref<16x32xf32, #tpu.memory_space<vmem>>, vector<1x32xf32>,
    %c3_i32 = arith.constant 3 : i32
    %20 = arith.addi %1, %c3_i32 : i32
    %21 = arith.index_cast %20 : i32 to index
    %22 = memref.load %arg1[%21] : memref<16xi32, #tpu.memory_space<smem>>
    %23 = arith.index_cast %22 : i32 to index
    %c0_6 = arith.constant 0 : index
    %24 = vector.load %arg2[%23, %c0_6] : memref<51x32xf32, #tpu.memory_space<vmem>>, vector<1x32xf32>
    %c3 = arith.constant 3 : index
    %c0_7 = arith.constant 0 : index
    %25 = vector.load %arg3[%c3, %c0_7] : memref<16x32xf32, #tpu.memory_space<vmem>>, vector<1x32xf32>
    tpu.vector_store %arg3[%c3, %c0_7], %24 {strides = array<i32>} : memref<16x32xf32, #tpu.memory_space<vmem>>, vector<1x32xf32>,
    %c4_i32 = arith.constant 4 : i32
    %26 = arith.addi %1, %c4_i32 : i32
    %27 = arith.index_cast %26 : i32 to index
    %28 = memref.load %arg1[%27] : memref<16xi32, #tpu.memory_space<smem>>
    %29 = arith.index_cast %28 : i32 to index
    %c0_8 = arith.constant 0 : index
    %30 = vector.load %arg2[%29, %c0_8] : memref<51x32xf32, #tpu.memory_space<vmem>>, vector<1x32xf32>
    %c4 = arith.constant 4 : index
    %c0_9 = arith.constant 0 : index
    %31 = vector.load %arg3[%c4, %c0_9] : memref<16x32xf32, #tpu.memory_space<vmem>>, vector<1x32xf32>
    tpu.vector_store %arg3[%c4, %c0_9], %30 {strides = array<i32>} : memref<16x32xf32, #tpu.memory_space<vmem>>, vector<1x32xf32>,
    %c5_i32 = arith.constant 5 : i32
    %32 = arith.addi %1, %c5_i32 : i32
    %33 = arith.index_cast %32 : i32 to index
    %34 = memref.load %arg1[%33] : memref<16xi32, #tpu.memory_space<smem>>
    %35 = arith.index_cast %34 : i32 to index
    %c0_10 = arith.constant 0 : index
    %36 = vector.load %arg2[%35, %c0_10] : memref<51x32xf32, #tpu.memory_space<vmem>>, vector<1x32xf32>
    %c5 = arith.constant 5 : index
    %c0_11 = arith.constant 0 : index
    %37 = vector.load %arg3[%c5, %c0_11] : memref<16x32xf32, #tpu.memory_space<vmem>>, vector<1x32xf32>
    tpu.vector_store %arg3[%c5, %c0_11], %36 {strides = array<i32>} : memref<16x32xf32, #tpu.memory_space<vmem>>, vector<1x32xf32>,
    %c6_i32 = arith.constant 6 : i32
    %38 = arith.addi %1, %c6_i32 : i32
    %39 = arith.index_cast %38 : i32 to index
    %40 = memref.load %arg1[%39] : memref<16xi32, #tpu.memory_space<smem>>
    %41 = arith.index_cast %40 : i32 to index
    %c0_12 = arith.constant 0 : index
    %42 = vector.load %arg2[%41, %c0_12] : memref<51x32xf32, #tpu.memory_space<vmem>>, vector<1x32xf32>
    %c6 = arith.constant 6 : index
    %c0_13 = arith.constant 0 : index
    %43 = vector.load %arg3[%c6, %c0_13] : memref<16x32xf32, #tpu.memory_space<vmem>>, vector<1x32xf32>
    tpu.vector_store %arg3[%c6, %c0_13], %42 {strides = array<i32>} : memref<16x32xf32, #tpu.memory_space<vmem>>, vector<1x32xf32>,
    %c7_i32 = arith.constant 7 : i32
    %44 = arith.addi %1, %c7_i32 : i32
    %45 = arith.index_cast %44 : i32 to index
    %46 = memref.load %arg1[%45] : memref<16xi32, #tpu.memory_space<smem>>
    %47 = arith.index_cast %46 : i32 to index
    %c0_14 = arith.constant 0 : index
    %48 = vector.load %arg2[%47, %c0_14] : memref<51x32xf32, #tpu.memory_space<vmem>>, vector<1x32xf32>
    %c7 = arith.constant 7 : index
    %c0_15 = arith.constant 0 : index
    %49 = vector.load %arg3[%c7, %c0_15] : memref<16x32xf32, #tpu.memory_space<vmem>>, vector<1x32xf32>
    tpu.vector_store %arg3[%c7, %c0_15], %48 {strides = array<i32>} : memref<16x32xf32, #tpu.memory_space<vmem>>, vector<1x32xf32>,
    %c8_i32 = arith.constant 8 : i32
    %50 = arith.addi %1, %c8_i32 : i32
    %51 = arith.index_cast %50 : i32 to index
    %52 = memref.load %arg1[%51] : memref<16xi32, #tpu.memory_space<smem>>
    %53 = arith.index_cast %52 : i32 to index
    %c0_16 = arith.constant 0 : index
    %54 = vector.load %arg2[%53, %c0_16] : memref<51x32xf32, #tpu.memory_space<vmem>>, vector<1x32xf32>
    %c8 = arith.constant 8 : index
    %c0_17 = arith.constant 0 : index
    %55 = vector.load %arg3[%c8, %c0_17] : memref<16x32xf32, #tpu.memory_space<vmem>>, vector<1x32xf32>
    tpu.vector_store %arg3[%c8, %c0_17], %54 {strides = array<i32>} : memref<16x32xf32, #tpu.memory_space<vmem>>, vector<1x32xf32>,
    %c9_i32 = arith.constant 9 : i32
    %56 = arith.addi %1, %c9_i32 : i32
    %57 = arith.index_cast %56 : i32 to index
    %58 = memref.load %arg1[%57] : memref<16xi32, #tpu.memory_space<smem>>
    %59 = arith.index_cast %58 : i32 to index
    %c0_18 = arith.constant 0 : index
    %60 = vector.load %arg2[%59, %c0_18] : memref<51x32xf32, #tpu.memory_space<vmem>>, vector<1x32xf32>
    %c9 = arith.constant 9 : index
    %c0_19 = arith.constant 0 : index
    %61 = vector.load %arg3[%c9, %c0_19] : memref<16x32xf32, #tpu.memory_space<vmem>>, vector<1x32xf32>
    tpu.vector_store %arg3[%c9, %c0_19], %60 {strides = array<i32>} : memref<16x32xf32, #tpu.memory_space<vmem>>, vector<1x32xf32>,
    %c10_i32 = arith.constant 10 : i32
    %62 = arith.addi %1, %c10_i32 : i32
    %63 = arith.index_cast %62 : i32 to index
    %64 = memref.load %arg1[%63] : memref<16xi32, #tpu.memory_space<smem>>
    %65 = arith.index_cast %64 : i32 to index
    %c0_20 = arith.constant 0 : index
    %66 = vector.load %arg2[%65, %c0_20] : memref<51x32xf32, #tpu.memory_space<vmem>>, vector<1x32xf32>
    %c10 = arith.constant 10 : index
    %c0_21 = arith.constant 0 : index
    %67 = vector.load %arg3[%c10, %c0_21] : memref<16x32xf32, #tpu.memory_space<vmem>>, vector<1x32xf32>
    tpu.vector_store %arg3[%c10, %c0_21], %66 {strides = array<i32>} : memref<16x32xf32, #tpu.memory_space<vmem>>, vector<1x32xf32>,
    %c11_i32 = arith.constant 11 : i32
    %68 = arith.addi %1, %c11_i32 : i32
    %69 = arith.index_cast %68 : i32 to index
    %70 = memref.load %arg1[%69] : memref<16xi32, #tpu.memory_space<smem>>
    %71 = arith.index_cast %70 : i32 to index
    %c0_22 = arith.constant 0 : index
    %72 = vector.load %arg2[%71, %c0_22] : memref<51x32xf32, #tpu.memory_space<vmem>>, vector<1x32xf32>
    %c11 = arith.constant 11 : index
    %c0_23 = arith.constant 0 : index
    %73 = vector.load %arg3[%c11, %c0_23] : memref<16x32xf32, #tpu.memory_space<vmem>>, vector<1x32xf32>
    tpu.vector_store %arg3[%c11, %c0_23], %72 {strides = array<i32>} : memref<16x32xf32, #tpu.memory_space<vmem>>, vector<1x32xf32>,
    %c12_i32 = arith.constant 12 : i32
    %74 = arith.addi %1, %c12_i32 : i32
    %75 = arith.index_cast %74 : i32 to index
    %76 = memref.load %arg1[%75] : memref<16xi32, #tpu.memory_space<smem>>
    %77 = arith.index_cast %76 : i32 to index
    %c0_24 = arith.constant 0 : index
    %78 = vector.load %arg2[%77, %c0_24] : memref<51x32xf32, #tpu.memory_space<vmem>>, vector<1x32xf32>
    %c12 = arith.constant 12 : index
    %c0_25 = arith.constant 0 : index
    %79 = vector.load %arg3[%c12, %c0_25] : memref<16x32xf32, #tpu.memory_space<vmem>>, vector<1x32xf32>
    tpu.vector_store %arg3[%c12, %c0_25], %78 {strides = array<i32>} : memref<16x32xf32, #tpu.memory_space<vmem>>, vector<1x32xf32>,
    %c13_i32 = arith.constant 13 : i32
    %80 = arith.addi %1, %c13_i32 : i32
    %81 = arith.index_cast %80 : i32 to index
    %82 = memref.load %arg1[%81] : memref<16xi32, #tpu.memory_space<smem>>
    %83 = arith.index_cast %82 : i32 to index
    %c0_26 = arith.constant 0 : index
    %84 = vector.load %arg2[%83, %c0_26] : memref<51x32xf32, #tpu.memory_space<vmem>>, vector<1x32xf32>
    %c13 = arith.constant 13 : index
    %c0_27 = arith.constant 0 : index
    %85 = vector.load %arg3[%c13, %c0_27] : memref<16x32xf32, #tpu.memory_space<vmem>>, vector<1x32xf32>
    tpu.vector_store %arg3[%c13, %c0_27], %84 {strides = array<i32>} : memref<16x32xf32, #tpu.memory_space<vmem>>, vector<1x32xf32>,
    %c14_i32 = arith.constant 14 : i32
    %86 = arith.addi %1, %c14_i32 : i32
    %87 = arith.index_cast %86 : i32 to index
    %88 = memref.load %arg1[%87] : memref<16xi32, #tpu.memory_space<smem>>
    %89 = arith.index_cast %88 : i32 to index
    %c0_28 = arith.constant 0 : index
    %90 = vector.load %arg2[%89, %c0_28] : memref<51x32xf32, #tpu.memory_space<vmem>>, vector<1x32xf32>
    %c14 = arith.constant 14 : index
    %c0_29 = arith.constant 0 : index
    %91 = vector.load %arg3[%c14, %c0_29] : memref<16x32xf32, #tpu.memory_space<vmem>>, vector<1x32xf32>
    tpu.vector_store %arg3[%c14, %c0_29], %90 {strides = array<i32>} : memref<16x32xf32, #tpu.memory_space<vmem>>, vector<1x32xf32>,
    %c15_i32 = arith.constant 15 : i32
    %92 = arith.addi %1, %c15_i32 : i32
    %93 = arith.index_cast %92 : i32 to index
    %94 = memref.load %arg1[%93] : memref<16xi32, #tpu.memory_space<smem>>
    %95 = arith.index_cast %94 : i32 to index
    %c0_30 = arith.constant 0 : index
    %96 = vector.load %arg2[%95, %c0_30] : memref<51x32xf32, #tpu.memory_space<vmem>>, vector<1x32xf32>
    %c15 = arith.constant 15 : index
    %c0_31 = arith.constant 0 : index
    %97 = vector.load %arg3[%c15, %c0_31] : memref<16x32xf32, #tpu.memory_space<vmem>>, vector<1x32xf32>
    tpu.vector_store %arg3[%c15, %c0_31], %96 {strides = array<i32>} : memref<16x32xf32, #tpu.memory_space<vmem>>, vector<1x32xf32>,
    return
  }
  func.func @transform_0(%arg0: i32, %arg1: memref<16xi32, #tpu.memory_space<smem>>) -> (i32, i32) {
    %c0_i32 = arith.constant 0 : i32
    %c0_i32_0 = arith.constant 0 : i32
    %c0_i32_1 = arith.constant 0 : i32
    return %c0_i32, %c0_i32_0 : i32, i32
  }
  func.func @transform_1(%arg0: i32, %arg1: memref<16xi32, #tpu.memory_space<smem>>) -> (i32, i32) {
    %c0_i32 = arith.constant 0 : i32
    %c0_i32_0 = arith.constant 0 : i32
    return %arg0, %c0_i32 : i32, i32
  }
}

</mosaic_0001>

<bundles_post_ra>
// kernel: tpu_custom_call.1
= control target key start
LH: loop header
LB: loop body
LE: loop exit
PB: predicated region body
PF: predicated region fallthrough
CT: control target
= control target key end

     0   :  { %s303_s0 = inlined_call_operand.vmem [shape: s32[16], index: 0, kind: input, shape index: {}]   ;;  %s304_s1 = inlined_call_operand.vmem [shape: f32[51,32], index: 1, kind: input, shape index: {}]   ;;  %s305_s2 = inlined_call_operand.hbm [shape: f32[16,32], index: 2, kind: output, shape index: {}]  }
   0x1   :  { %s7_s11 = sshll.u32 %s303_s0, 4  ;;  %s8_s11 = int_to_ptr.vmem [resolvable:$true] %s7_s11 }
   0x2   :  { %s148_s12 = scalar_lea.vmem %s8_s11, 16  ;;  %p153_p1 = scmp.lt.s32.totalorder %s8_s11, %s8_s11 }
   0x3   :  { %p149_p0 = scmp.ne.s32.totalorder %s8_s11, %s148_s12  ;;  %p154_p2 = scmp.lt.s32.totalorder %s148_s12, %s148_s12 }
   0x5   :  { %p155_p3 = por %p154_p2, %p153_p1 }
   0x7   :  { %p156_p4 = pnand %p155_p3, %p149_p0 }
   0x9   :  { %159 = shalt.err (!%p156_p4)  }
   0xa   :  { %s186_s13 = smov [#allocation3]  }
   0xb   :  { %10 = dma.vmem_to_smem %s8_s11, 16, %s186_s13, [#allocation2] }
   0xc   :  { %182 = dma.done.wait [#allocation2], 16 }
   0xd   :  { %183 = vsyncadd [#allocation2], 4294967280 }
   0xe   :  { %12 = sfence }
   0xf   :  { %s17_s14 = sld [smem:[#allocation3]]  ;;  %s129_s15 = sld [smem:[#allocation3 + $0x1]] }
  0x10   :  { %s130_s16 = sld [smem:[#allocation3 + $0x2]]  ;;  %s131_s17 = sld [smem:[#allocation3 + $0x3]] }
  0x11   :  { %13 = vsyncpa [#allocation5], 0  ;;  %s132_s18 = sld [smem:[#allocation3 + $0x4]]  ;;  %s133_s0 = sld [smem:[#allocation3 + $0x5]]  ;;  %vm20_vm0 = vcmask 253952  }
  0x12   :  { %s134_s19 = sld [smem:[#allocation3 + $0x6]]  ;;  %s135_s20 = sld [smem:[#allocation3 + $0x7]] }
  0x13   :  { %s208_s21 = sld [smem:[#allocation3 + $0x8]]  ;;  %s210_s22 = sld [smem:[#allocation3 + $0x9]] }
  0x14   :  { %s212_s23 = sld [smem:[#allocation3 + $0xa]]  ;;  %s214_s24 = sld [smem:[#allocation3 + $0xb]] }
  0x15   :  { %s18_s27 = scalar_lea.vmem %s304_s1, %s17_s14  ;;  %s24_s30 = scalar_lea.vmem %s304_s1, %s129_s15 }
  0x16   :  { %v19_v0 = vld [vmem:[%s18_s27] sm:$0x1]  ;;  %s29_s5 = scalar_lea.vmem %s304_s1, %s130_s16  ;;  %s34_s8 = scalar_lea.vmem %s304_s1, %s131_s17 }
  0x17   :  { %v25_v1 = vld [vmem:[%s24_s30] sm:$0x1]  ;;  %21 = vst.msk [vmem:[#allocation4] sm:$0x1] %vm20_vm0, %v19_v0  ;;  %s39_s11 = scalar_lea.vmem %s304_s1, %s132_s18  ;;  %s44_s14 = scalar_lea.vmem %s304_s1, %s133_s0 }
  0x18   :  { %26 = vst.msk [vmem:[#allocation4 + $0x1] sm:$0x1] %vm20_vm0, %v25_v1  ;;  %v30_v2 = vld [vmem:[%s29_s5] sm:$0x1]  ;;  %s49_s17 = scalar_lea.vmem %s304_s1, %s134_s19  ;;  %s54_s18 = scalar_lea.vmem %s304_s1, %s135_s20 }
  0x19   :  { %v35_v3 = vld [vmem:[%s34_s8] sm:$0x1]  ;;  %31 = vst.msk [vmem:[#allocation4 + $0x2] sm:$0x1] %vm20_vm0, %v30_v2  ;;  %s59_s28 = scalar_lea.vmem %s304_s1, %s208_s21  ;;  %s64_s3 = scalar_lea.vmem %s304_s1, %s210_s22 }
  0x1a   :  { %36 = vst.msk [vmem:[#allocation4 + $0x3] sm:$0x1] %vm20_vm0, %v35_v3  ;;  %v40_v4 = vld [vmem:[%s39_s11] sm:$0x1]  ;;  %s69_s4 = scalar_lea.vmem %s304_s1, %s212_s23  ;;  %s74_s7 = scalar_lea.vmem %s304_s1, %s214_s24 }
  0x1b   :  { %v45_v5 = vld [vmem:[%s44_s14] sm:$0x1]  ;;  %41 = vst.msk [vmem:[#allocation4 + $0x4] sm:$0x1] %vm20_vm0, %v40_v4  ;;  %s140_s21 = sld [smem:[#allocation3 + $0xc]]  ;;  %s141_s22 = sld [smem:[#allocation3 + $0xd]] }
  0x1c   :  { %46 = vst.msk [vmem:[#allocation4 + $0x5] sm:$0x1] %vm20_vm0, %v45_v5  ;;  %v50_v6 = vld [vmem:[%s49_s17] sm:$0x1]  ;;  %s142_s8 = sld [smem:[#allocation3 + $0xe]]  ;;  %s143_s9 = sld [smem:[#allocation3 + $0xf]] }
  0x1d   :  { %v55_v7 = vld [vmem:[%s54_s18] sm:$0x1]  ;;  %51 = vst.msk [vmem:[#allocation4 + $0x6] sm:$0x1] %vm20_vm0, %v50_v6  ;;  %s187_s10 = smov [#allocation4]  }
  0x1e   :  { %56 = vst.msk [vmem:[#allocation4 + $0x7] sm:$0x1] %vm20_vm0, %v55_v7  ;;  %v60_v8 = vld [vmem:[%s59_s28] sm:$0x1]  ;;  %s102_s23 = sshll.u32 %s187_s10, 4  ;;  %s271_s23 = int_to_ptr.vmem [resolvable:$true] %s102_s23 }
  0x1f   :  { %v65_v9 = vld [vmem:[%s64_s3] sm:$0x1]  ;;  %61 = vst.msk [vmem:[#allocation4 + $0x8] sm:$0x1] %vm20_vm0, %v60_v8  ;;  %s160_s27 = scalar_lea.vmem %s271_s23, 256  ;;  %p165_p6 = scmp.lt.s32.totalorder %s271_s23, %s271_s23 }
  0x20   :  { %66 = vst.msk [vmem:[#allocation4 + $0x9] sm:$0x1] %vm20_vm0, %v65_v9  ;;  %v70_v10 = vld [vmem:[%s69_s4] sm:$0x1]  ;;  %p161_p5 = scmp.ne.s32.totalorder %s271_s23, %s160_s27  ;;  %p166_p7 = scmp.lt.s32.totalorder %s160_s27, %s160_s27 }
  0x21   :  { %v75_v11 = vld [vmem:[%s74_s7] sm:$0x1]  ;;  %71 = vst.msk [vmem:[#allocation4 + $0xa] sm:$0x1] %vm20_vm0, %v70_v10  ;;  %s79_s24 = scalar_lea.vmem %s304_s1, %s140_s21  ;;  %s84_s15 = scalar_lea.vmem %s304_s1, %s141_s22 }
  0x22   :  { %76 = vst.msk [vmem:[#allocation4 + $0xb] sm:$0x1] %vm20_vm0, %v75_v11  ;;  %v80_v12 = vld [vmem:[%s79_s24] sm:$0x1]  ;;  %s89_s25 = scalar_lea.vmem %s304_s1, %s142_s8  ;;  %s94_s0 = scalar_lea.vmem %s304_s1, %s143_s9 }
  0x23   :  { %81 = vst.msk [vmem:[#allocation4 + $0xc] sm:$0x1] %vm20_vm0, %v80_v12  ;;  %v85_v13 = vld [vmem:[%s84_s15] sm:$0x1]  ;;  %p167_p8 = por %p166_p7, %p165_p6 }
  0x24   :  { %v90_v14 = vld [vmem:[%s89_s25] sm:$0x1]  ;;  %86 = vst.msk [vmem:[#allocation4 + $0xd] sm:$0x1] %vm20_vm0, %v85_v13 }
  0x25   :  { %91 = vst.msk [vmem:[#allocation4 + $0xe] sm:$0x1] %vm20_vm0, %v90_v14  ;;  %v95_v15 = vld [vmem:[%s94_s0] sm:$0x1]  ;;  %p168_p9 = pnand %p167_p8, %p161_p5 }
  0x26   :  { %96 = vst.msk [vmem:[#allocation4 + $0xf] sm:$0x1] %vm20_vm0, %v95_v15 }
  0x27   :  { %171 = shalt.err (!%p168_p9)
}
  0x28   :  { %s172_s30 = scalar_lea.hbm %s305_s2, 256 }
  0x29   :  { %p173_p10 = scmp.ne.s32.totalorder %s305_s2, %s172_s30  ;;  %p176_p11 = scmp.lt.u32.totalorder %s172_s30, %s305_s2 }
  0x2b   :  { %p178_p12 = pnand %p176_p11, %p173_p10 }
  0x2d   :  { %181 = shalt.err (!%p178_p12)
}
  0x2e   :  { %s188_s4 = smov 128   ;;  %s189_s5 = smov 8  }
  0x2f   :  { %108 = dma.vmem_to_hbm [thread:$0]  %s271_s23, 256, %s305_s2, [#allocation5], %s188_s4, %s188_s4, %s189_s5  }
  0x30   :  { %184 = dma.done.wait [#allocation5], 256  }
  0x31   :  { %185 = vsyncadd [#allocation5], 4294967040 }
  0x32   :  { %112 = vsyncpa [#allocation5], 1 }

</bundles_post_ra>
